<compile_context>
chip_gen: v7x
topology: tpu7x:2x2x1
jax: 0.10.0
libtpu: 0.0.40
codegen_flags: <defaults>
</compile_context>

<pallas_src>
import jax
import jax.numpy as jnp
import numpy as np
from jax.experimental import pallas as pl
from jax.experimental.pallas import tpu as pltpu


def intra_gcn_kernel(x_ref, ah1_ref, ah2_ref, w1_ref, w2_ref,
                     fcw_ref, fcb_ref, clsw_ref, clsb_ref, out_ref):
    C = x_ref.shape[0]            # classNum (one batch element per grid step)
    Do = w2_ref.shape[1]          # GCN output dim
    cdt = w1_ref.dtype            # matmul operand dtype (f32 demo; bf16 at prod shapes)

    x = x_ref[...]                                                     # (C, D)

    # --- 2-layer GCN, both adjacency branches fused ------------------------------------
    # Shared first projection: computed ONCE, reused by both branches.
    s1 = jnp.dot(x, w1_ref[...], preferred_element_type=jnp.float32)   # (C, Dm)

    # First graph hop, both branches in one matmul: ah1 = [adj1; adj2] -> (2C, C).
    h1 = jnp.dot(ah1_ref[...], s1.astype(cdt),
                 preferred_element_type=jnp.float32)                   # (2C, Dm)
    h1 = jnp.maximum(h1, 0.2 * h1)                                     # LeakyReLU(0.2)

    # Second projection (both branches at once).
    s2 = jnp.dot(h1.astype(cdt), w2_ref[...],
                 preferred_element_type=jnp.float32)                   # (2C, Do)

    # Second graph hop: ah2 = blockdiag(adj1, adj2) -> (2C, 2C) (tiny).
    g = jnp.dot(ah2_ref[...], s2.astype(cdt),
                preferred_element_type=jnp.float32)                    # (2C, Do)
    f1 = g[:C]                                                         # (C, Do) branch 1
    f2 = g[C:]                                                         # (C, Do) branch 2

    # --- fc over concat([f1, f2, sem]) --------------------------------------------------
    # fc weight rows are stacked [fcw1; fcw2; fcw3]; slices are taken on the REF (zero-cost
    # views, Do is a multiple of 8), same math as the single concat matmul without an
    # in-kernel lane concat.
    pre = (jnp.dot(f1.astype(cdt), fcw_ref[0:Do, :],
                   preferred_element_type=jnp.float32)
           + jnp.dot(f2.astype(cdt), fcw_ref[Do:2 * Do, :],
                     preferred_element_type=jnp.float32)
           + jnp.dot(x, fcw_ref[2 * Do:, :],
                     preferred_element_type=jnp.float32)
           + fcb_ref[...])                                             # (C, Dout)
    out = jnp.tanh(pre)

    # --- Element_Wise_Layer: mul + reduce + per-class bias ------------------------------
    out_ref[...] = (jnp.sum(out * clsw_ref[...], axis=-1, keepdims=True)
                    + clsb_ref[...])                                   # (C, 1)


def intra_gcn_forward(x_input, semantic_feature, params, *, matmul_dtype=jnp.float32):
    """semantic_feature: (B, C, D) float32. Returns (B, C) float32."""
    B = x_input.shape[0]
    Bs, C, D = semantic_feature.shape
    assert Bs == B
    Dm = params["gc_w1"].shape[1]
    Do = params["gc_w2"].shape[1]
    Dout = params["fc_w"].shape[0]
    # fc takes 3*imageFeatureDim inputs -> GCN outputDim must equal imageFeatureDim.
    assert Do == D, "outputDim must equal imageFeatureDim (fc expects 3*imageFeatureDim)"
    assert params["fc_w"].shape[1] == 2 * Do + D

    f32 = jnp.float32
    cdt = matmul_dtype
    itemsize = jnp.dtype(cdt).itemsize

    # Batch folded into rows; each grid step sees one (C, D) slab.
    sem_flat = semantic_feature.reshape(B * C, D).astype(cdt)

    # O(C^2) adjacency operators: branch-stacked for hop 1, block-diagonal for hop 2.
    adj1 = params["adj1"].astype(f32)
    adj2 = params["adj2"].astype(f32)
    a_hop1 = jnp.concatenate([adj1, adj2], axis=0).astype(cdt)         # (2C, C)
    zeros = jnp.zeros((C, C), f32)
    a_hop2 = jnp.concatenate(
        [jnp.concatenate([adj1, zeros], axis=1),
         jnp.concatenate([zeros, adj2], axis=1)], axis=0).astype(cdt)  # (2C, 2C)

    # fc weight: PyTorch (Dout, 3*D) -> row-stacked (2*Do + D, Dout) = [fcw1; fcw2; fcw3].
    fcw = params["fc_w"].T.astype(cdt)
    fcb = params["fc_b"].reshape(1, Dout).astype(f32)

    # Classifier params passed once (per-batch reuse via constant index_map), no tiling.
    clsw = params["cls_w"].astype(f32)                                 # (C, Dout)
    clsb = params["cls_b"].reshape(C, 1).astype(f32)                   # (C, 1)

    w1 = params["gc_w1"].astype(cdt)
    w2 = params["gc_w2"].astype(cdt)

    # Per-step VMEM working set estimate (double-buffered batch-varying blocks + resident
    # weights + f32 intermediates), with headroom; clamped below v7x's 64 MiB physical.
    blocks = (2 * C * D * itemsize                       # semantic block (x2 buffers)
              + (2 * C * C + 4 * C * C) * itemsize       # adjacencies
              + (D * Dm + Dm * Do) * itemsize            # GCN weights
              + (2 * Do + D) * Dout * itemsize           # fc weight
              + (Dout + C * Dout + C) * 4                # fcb, clsw, clsb
              + 2 * C * 4)                               # output block (x2 buffers)
    inter = (C * Dm + 2 * C * Dm + 4 * C * Do + 2 * C * Dout) * 4
    vmem_bytes = int(min(max(2 * (blocks + inter), 32 << 20), 56 << 20))

    out = pl.pallas_call(
        intra_gcn_kernel,
        out_shape=jax.ShapeDtypeStruct((B * C, 1), jnp.float32),
        grid_spec=pltpu.PrefetchScalarGridSpec(
            num_scalar_prefetch=0,
            grid=(B,),
            in_specs=[
                pl.BlockSpec((C, D), lambda b: (b, 0)),               # semantic (varies)
                pl.BlockSpec((2 * C, C), lambda b: (0, 0)),           # hop-1 adjacency
                pl.BlockSpec((2 * C, 2 * C), lambda b: (0, 0)),       # hop-2 adjacency
                pl.BlockSpec((D, Dm), lambda b: (0, 0)),              # gc_w1
                pl.BlockSpec((Dm, Do), lambda b: (0, 0)),             # gc_w2
                pl.BlockSpec((2 * Do + D, Dout), lambda b: (0, 0)),   # fc weight (stacked)
                pl.BlockSpec((1, Dout), lambda b: (0, 0)),            # fc bias
                pl.BlockSpec((C, Dout), lambda b: (0, 0)),            # cls weight
                pl.BlockSpec((C, 1), lambda b: (0, 0)),               # cls bias
            ],
            out_specs=pl.BlockSpec((C, 1), lambda b: (b, 0)),
        ),
        compiler_params=pltpu.CompilerParams(
            dimension_semantics=("parallel",),
            vmem_limit_bytes=vmem_bytes,
        ),
    )(sem_flat, a_hop1, a_hop2, w1, w2, fcw, fcb, clsw, clsb)

    return out.reshape(B, C)


def reference_forward(semantic_feature, params):
    """Pure-JAX reference mirroring the PyTorch module semantics."""
    B, C, D = semantic_feature.shape

    def gcn(x, adj):
        s1 = x @ params["gc_w1"]                     # (B, C, Dm)
        h1 = jnp.einsum("ck,bkd->bcd", adj, s1)
        h1 = jnp.where(h1 > 0, h1, 0.2 * h1)
        s2 = h1 @ params["gc_w2"]                    # (B, C, Do)
        return jnp.einsum("ck,bkd->bcd", adj, s2)

    f1 = gcn(semantic_feature, params["adj1"])
    f2 = gcn(semantic_feature, params["adj2"])
    intra = jnp.concatenate([f1, f2], axis=2)        # (B, C, 2*Do)
    cat = jnp.concatenate(
        [intra.reshape(B * C, -1), semantic_feature.reshape(-1, D)], axis=1)
    out = jnp.tanh(cat @ params["fc_w"].T + params["fc_b"])
    out = out.reshape(B, C, -1)
    return jnp.sum(out * params["cls_w"][None], axis=2) + params["cls_b"][None]


if __name__ == "__main__":
    # Small shapes consistent with the module (outputDim == imageFeatureDim is required
    # by the 3*imageFeatureDim fc input size).
    B, classNum = 2, 8
    imageFeatureDim, intermediaDim, outputDim = 32, 16, 32

    key = jax.random.PRNGKey(0)
    ks = jax.random.split(key, 10)

    x_input = jax.random.normal(ks[0], (B, 4, 16, 16), jnp.float32)   # only supplies batch size
    semanticFeature = jax.random.normal(
        ks[1], (B, classNum, imageFeatureDim), jnp.float32)

    params = {
        "adj1": jax.random.uniform(ks[2], (classNum, classNum), jnp.float32),
        "adj2": jax.random.uniform(ks[3], (classNum, classNum), jnp.float32),
        "gc_w1": 0.1 * jax.random.normal(ks[4], (imageFeatureDim, intermediaDim), jnp.float32),
        "gc_w2": 0.1 * jax.random.normal(ks[5], (intermediaDim, outputDim), jnp.float32),
        "fc_w": 0.1 * jax.random.normal(ks[6], (outputDim, 3 * imageFeatureDim), jnp.float32),
        "fc_b": 0.1 * jax.random.normal(ks[7], (outputDim,), jnp.float32),
        "cls_w": 0.1 * jax.random.normal(ks[8], (classNum, outputDim), jnp.float32),
        "cls_b": 0.1 * jax.random.normal(ks[9], (classNum,), jnp.float32),
    }

    result = intra_gcn_forward(x_input, semanticFeature, params)
    result = jax.block_until_ready(result)

    ref = jax.block_until_ready(reference_forward(semanticFeature, params))
    assert result.shape == (B, classNum), result.shape
    np.testing.assert_allclose(np.asarray(result), np.asarray(ref), rtol=1e-4, atol=1e-4)

    print("KERNEL_OK")
</pallas_src>

<mosaic_0001>
module attributes {stable_mosaic.version = 11 : i64} {
  func.func @intra_gcn_kernel(%arg0: i32, %arg1: memref<8x32xf32, #tpu.memory_space<vmem>>, %arg2: memref<16x8xf32, #tpu.memory_space<vmem>>, %arg3: memref<16x16xf32, #tpu.memory_space<vmem>>, %arg4: memref<32x16xf32, #tpu.memory_space<vmem>>, %arg5: memref<16x32xf32, #tpu.memory_space<vmem>>, %arg6: memref<96x32xf32, #tpu.memory_space<vmem>>, %arg7: memref<1x32xf32, #tpu.memory_space<vmem>>, %arg8: memref<8x32xf32, #tpu.memory_space<vmem>>, %arg9: memref<8x1xf32, #tpu.memory_space<vmem>>, %arg10: memref<8x1xf32, #tpu.memory_space<vmem>>) attributes {dimension_semantics = [#tpu.dimension_semantics<parallel>], iteration_bounds = array<i64: 2>, scalar_prefetch = 0 : i64, scratch_operands = 0 : i64, tpu.core_type = #tpu.core_type<tc>, window_params = [{transform_indices = @transform_0, window_bounds = array<i64: 8, 32>}, {pipeline_mode = #tpu.pipeline_mode<synchronous>, transform_indices = @transform_1, window_bounds = array<i64: 16, 8>}, {pipeline_mode = #tpu.pipeline_mode<synchronous>, transform_indices = @transform_2, window_bounds = array<i64: 16, 16>}, {pipeline_mode = #tpu.pipeline_mode<synchronous>, transform_indices = @transform_3, window_bounds = array<i64: 32, 16>}, {pipeline_mode = #tpu.pipeline_mode<synchronous>, transform_indices = @transform_4, window_bounds = array<i64: 16, 32>}, {pipeline_mode = #tpu.pipeline_mode<synchronous>, transform_indices = @transform_5, window_bounds = array<i64: 96, 32>}, {pipeline_mode = #tpu.pipeline_mode<synchronous>, transform_indices = @transform_6, window_bounds = array<i64: 1, 32>}, {pipeline_mode = #tpu.pipeline_mode<synchronous>, transform_indices = @transform_7, window_bounds = array<i64: 8, 32>}, {pipeline_mode = #tpu.pipeline_mode<synchronous>, transform_indices = @transform_8, window_bounds = array<i64: 8, 1>}, {transform_indices = @transform_9, window_bounds = array<i64: 8, 1>}]} {
    %c0 = arith.constant 0 : index
    %c0_0 = arith.constant 0 : index
    %0 = vector.load %arg1[%c0, %c0_0] : memref<8x32xf32, #tpu.memory_space<vmem>>, vector<8x32xf32>
    %c0_1 = arith.constant 0 : index
    %c0_2 = arith.constant 0 : index
    %1 = vector.load %arg4[%c0_1, %c0_2] : memref<32x16xf32, #tpu.memory_space<vmem>>, vector<32x16xf32>
    %cst = arith.constant dense<0.000000e+00> : vector<8x16xf32>
    %2 = tpu.matmul %0, %1, %cst {dimension_numbers = #tpu.dot_dimension_numbers<[1], [0], [0], [1], [0, 0, 1, 1], [], []>} : vector<8x32xf32>, vector<32x16xf32>, vector<8x16xf32> -> vector<8x16xf32>
    %c0_3 = arith.constant 0 : index
    %c0_4 = arith.constant 0 : index
    %3 = vector.load %arg2[%c0_3, %c0_4] : memref<16x8xf32, #tpu.memory_space<vmem>>, vector<16x8xf32>
    %cst_5 = arith.constant dense<0.000000e+00> : vector<16x16xf32>
    %4 = tpu.matmul %3, %2, %cst_5 {dimension_numbers = #tpu.dot_dimension_numbers<[1], [0], [0], [1], [0, 0, 1, 1], [], []>} : vector<16x8xf32>, vector<8x16xf32>, vector<16x16xf32> -> vector<16x16xf32>
    %cst_6 = arith.constant 2.000000e-01 : f32
    %5 = vector.broadcast %cst_6 : f32 to vector<16x16xf32>
    %6 = arith.mulf %5, %4 : vector<16x16xf32>
    %7 = arith.maximumf %4, %6 : vector<16x16xf32>
    %c0_7 = arith.constant 0 : index
    %c0_8 = arith.constant 0 : index
    %8 = vector.load %arg5[%c0_7, %c0_8] : memref<16x32xf32, #tpu.memory_space<vmem>>, vector<16x32xf32>
    %cst_9 = arith.constant dense<0.000000e+00> : vector<16x32xf32>
    %9 = tpu.matmul %7, %8, %cst_9 {dimension_numbers = #tpu.dot_dimension_numbers<[1], [0], [0], [1], [0, 0, 1, 1], [], []>} : vector<16x16xf32>, vector<16x32xf32>, vector<16x32xf32> -> vector<16x32xf32>
    %c0_10 = arith.constant 0 : index
    %c0_11 = arith.constant 0 : index
    %10 = vector.load %arg3[%c0_10, %c0_11] : memref<16x16xf32, #tpu.memory_space<vmem>>, vector<16x16xf32>
    %cst_12 = arith.constant dense<0.000000e+00> : vector<16x32xf32>
    %11 = tpu.matmul %10, %9, %cst_12 {dimension_numbers = #tpu.dot_dimension_numbers<[1], [0], [0], [1], [0, 0, 1, 1], [], []>} : vector<16x16xf32>, vector<16x32xf32>, vector<16x32xf32> -> vector<16x32xf32>
    %12 = vector.extract_strided_slice %11 {offsets = [0, 0], sizes = [8, 32], strides = [1, 1]} : vector<16x32xf32> to vector<8x32xf32>
    %13 = vector.extract_strided_slice %11 {offsets = [8, 0], sizes = [8, 32], strides = [1, 1]} : vector<16x32xf32> to vector<8x32xf32>
    %c0_13 = arith.constant 0 : index
    %c0_14 = arith.constant 0 : index
    %14 = vector.load %arg6[%c0_13, %c0_14] : memref<96x32xf32, #tpu.memory_space<vmem>>, vector<32x32xf32>
    %cst_15 = arith.constant dense<0.000000e+00> : vector<8x32xf32>
    %15 = tpu.matmul %12, %14, %cst_15 {dimension_numbers = #tpu.dot_dimension_numbers<[1], [0], [0], [1], [0, 0, 1, 1], [], []>} : vector<8x32xf32>, vector<32x32xf32>, vector<8x32xf32> -> vector<8x32xf32>
    %c32 = arith.constant 32 : index
    %c0_16 = arith.constant 0 : index
    %16 = vector.load %arg6[%c32, %c0_16] : memref<96x32xf32, #tpu.memory_space<vmem>>, vector<32x32xf32>
    %cst_17 = arith.constant dense<0.000000e+00> : vector<8x32xf32>
    %17 = tpu.matmul %13, %16, %cst_17 {dimension_numbers = #tpu.dot_dimension_numbers<[1], [0], [0], [1], [0, 0, 1, 1], [], []>} : vector<8x32xf32>, vector<32x32xf32>, vector<8x32xf32> -> vector<8x32xf32>
    %18 = arith.addf %15, %17 : vector<8x32xf32>
    %c64 = arith.constant 64 : index
    %c0_18 = arith.constant 0 : index
    %19 = vector.load %arg6[%c64, %c0_18] : memref<96x32xf32, #tpu.memory_space<vmem>>, vector<32x32xf32>
    %cst_19 = arith.constant dense<0.000000e+00> : vector<8x32xf32>
    %20 = tpu.matmul %0, %19, %cst_19 {dimension_numbers = #tpu.dot_dimension_numbers<[1], [0], [0], [1], [0, 0, 1, 1], [], []>} : vector<8x32xf32>, vector<32x32xf32>, vector<8x32xf32> -> vector<8x32xf32>
    %21 = arith.addf %18, %20 : vector<8x32xf32>
    %c0_20 = arith.constant 0 : index
    %c0_21 = arith.constant 0 : index
    %22 = vector.load %arg7[%c0_20, %c0_21] : memref<1x32xf32, #tpu.memory_space<vmem>>, vector<1x32xf32>
    %23 = vector.broadcast %22 : vector<1x32xf32> to vector<8x32xf32>
    %24 = arith.addf %21, %23 : vector<8x32xf32>
    %25 = math.tanh %24 : vector<8x32xf32>
    %c0_22 = arith.constant 0 : index
    %c0_23 = arith.constant 0 : index
    %26 = vector.load %arg8[%c0_22, %c0_23] : memref<8x32xf32, #tpu.memory_space<vmem>>, vector<8x32xf32>
    %27 = arith.mulf %25, %26 : vector<8x32xf32>
    %cst_24 = arith.constant dense<0.000000e+00> : vector<8xf32>
    %28 = vector.multi_reduction <add>, %27, %cst_24 [1] : vector<8x32xf32> to vector<8xf32>
    %29 = vector.shape_cast %28 : vector<8xf32> to vector<8x1xf32>
    %c0_25 = arith.constant 0 : index
    %c0_26 = arith.constant 0 : index
    %30 = vector.load %arg9[%c0_25, %c0_26] : memref<8x1xf32, #tpu.memory_space<vmem>>, vector<8x1xf32>
    %31 = arith.addf %29, %30 : vector<8x1xf32>
    %c0_27 = arith.constant 0 : index
    %c0_28 = arith.constant 0 : index
    %32 = vector.load %arg10[%c0_27, %c0_28] : memref<8x1xf32, #tpu.memory_space<vmem>>, vector<8x1xf32>
    tpu.vector_store %arg10[%c0_27, %c0_28], %31 {strides = array<i32>} : memref<8x1xf32, #tpu.memory_space<vmem>>, vector<8x1xf32>,
    return
  }
  func.func @transform_0(%arg0: i32) -> (i32, i32) {
    %c0_i32 = arith.constant 0 : i32
    %c0_i32_0 = arith.constant 0 : i32
    return %arg0, %c0_i32 : i32, i32
  }
  func.func @transform_1(%arg0: i32) -> (i32, i32) {
    %c0_i32 = arith.constant 0 : i32
    %c0_i32_0 = arith.constant 0 : i32
    %c0_i32_1 = arith.constant 0 : i32
    return %c0_i32, %c0_i32_0 : i32, i32
  }
  func.func @transform_2(%arg0: i32) -> (i32, i32) {
    %c0_i32 = arith.constant 0 : i32
    %c0_i32_0 = arith.constant 0 : i32
    %c0_i32_1 = arith.constant 0 : i32
    return %c0_i32, %c0_i32_0 : i32, i32
  }
  func.func @transform_3(%arg0: i32) -> (i32, i32) {
    %c0_i32 = arith.constant 0 : i32
    %c0_i32_0 = arith.constant 0 : i32
    %c0_i32_1 = arith.constant 0 : i32
    return %c0_i32, %c0_i32_0 : i32, i32
  }
  func.func @transform_4(%arg0: i32) -> (i32, i32) {
    %c0_i32 = arith.constant 0 : i32
    %c0_i32_0 = arith.constant 0 : i32
    %c0_i32_1 = arith.constant 0 : i32
    return %c0_i32, %c0_i32_0 : i32, i32
  }
  func.func @transform_5(%arg0: i32) -> (i32, i32) {
    %c0_i32 = arith.constant 0 : i32
    %c0_i32_0 = arith.constant 0 : i32
    %c0_i32_1 = arith.constant 0 : i32
    return %c0_i32, %c0_i32_0 : i32, i32
  }
  func.func @transform_6(%arg0: i32) -> (i32, i32) {
    %c0_i32 = arith.constant 0 : i32
    %c0_i32_0 = arith.constant 0 : i32
    %c0_i32_1 = arith.constant 0 : i32
    return %c0_i32, %c0_i32_0 : i32, i32
  }
  func.func @transform_7(%arg0: i32) -> (i32, i32) {
    %c0_i32 = arith.constant 0 : i32
    %c0_i32_0 = arith.constant 0 : i32
    %c0_i32_1 = arith.constant 0 : i32
    return %c0_i32, %c0_i32_0 : i32, i32
  }
  func.func @transform_8(%arg0: i32) -> (i32, i32) {
    %c0_i32 = arith.constant 0 : i32
    %c0_i32_0 = arith.constant 0 : i32
    %c0_i32_1 = arith.constant 0 : i32
    return %c0_i32, %c0_i32_0 : i32, i32
  }
  func.func @transform_9(%arg0: i32) -> (i32, i32) {
    %c0_i32 = arith.constant 0 : i32
    %c0_i32_0 = arith.constant 0 : i32
    return %arg0, %c0_i32 : i32, i32
  }
}

</mosaic_0001>

<bundles_post_ra>
// kernel: tpu_custom_call.1
= control target key start
LH: loop header
LB: loop body
LE: loop exit
PB: predicated region body
PF: predicated region fallthrough
CT: control target
= control target key end

     0   :  { %s1182_s30 = smov 0   ;;  %s1310_s0 = inlined_call_operand.vmem [shape: f32[16,32], index: 0, kind: input, shape index: {}]   ;;  %s1311_s1 = inlined_call_operand.vmem [shape: f32[16,8], index: 1, kind: input, shape index: {}]   ;;  %s1312_s2 = inlined_call_operand.vmem [shape: f32[16,16], index: 2, kind: input, shape index: {}]   ;;  %s1313_s3 = inlined_call_operand.vmem [shape: f32[32,16], index: 3, kind: input, shape index: {}]   ;;  %s1314_s4 = inlined_call_operand.vmem [shape: f32[16,32], index: 4, kind: input, shape index: {}]   ;;  %s1315_s5 = inlined_call_operand.vmem [shape: f32[96,32], index: 5, kind: input, shape index: {}]   ;;  %s1316_s6 = inlined_call_operand.vmem [shape: f32[1,32], index: 6, kind: input, shape index: {}]   ;;  %s1317_s7 = inlined_call_operand.vmem [shape: f32[8,32], index: 7, kind: input, shape index: {}]   ;;  %s1318_s8 = inlined_call_operand.vmem [shape: f32[8,1], index: 8, kind: input, shape index: {}]   ;;  %s1319_s9 = inlined_call_operand.vmem [shape: f32[16,1], index: 9, kind: output, shape index: {}]  }
   0x1 LB: > { %s962_s10 = sadd.s32 4294967295, %s1127_s30   ;;  %p966_p0 = scmp.ge.s32.totalorder %s1127_s30, 1  ;;  %s1127_s30 = sphi %s1182_s30, %s19_s30  }
   0x2   : > { %p286_p1 = scmp.lt.s32.totalorder %s1127_s30, 3 }
   0x4   : > { %p287_p2 = pnand %p966_p0, %p286_p1 }
   0x5   : > { %v329_v0 = vld [vmem:[%s1313_s3] sm:$0xff] (!%p287_p2)  ;;  %v330_v1 = vld [vmem:[%s1313_s3 + $0x8] sm:$0xff] (!%p287_p2)  ;;  %v331_v2 = vld [vmem:[%s1313_s3 + $0x10] sm:$0xff] (!%p287_p2)  ;;  %v1129_v3 = vmov (!%p287_p2), 0.0|0.0   ;;  %vm1130_vm0 = vmmov (!%p287_p2), 0   ;;  %v1131_v6 = vmov (!%p287_p2), 0.0  }
   0x6   : > { %290 = sbr.rel (%p287_p2) target bundleno = 1263 (0x4ef), region = 56  ;;  %1076 = vmatprep.subr.bf16.mxu0 (!%p287_p2), %v1129_v3  ;;  %v1077_v4 = vpack.c.bf16 (!%p287_p2), %v330_v1, %v329_v0  ;;  %v332_v5 = vld [vmem:[%s1313_s3 + $0x18] sm:$0xff] (!%p287_p2)  ;;  %1021 = vmatprep.mubr.msk.f32.mxu0 (!%p287_p2), %vm1130_vm0, %v1131_v6  ;;  %p320_p3 = scmp.lt.s32.totalorder (!%p287_p2), %s962_s10, 1  ;;  %vm333_vm1 = vcmask (!%p287_p2), 261120   ;;  %v407_v9 = vld [vmem:[%s1311_s1] sm:$0xff] (!%p287_p2)  ;;  %vm409_vm2 = vcmask (!%p287_p2), 64512  }
   0x7   : > { %v1080_v7 = vpack.c.bf16 (!%p287_p2), %v332_v5, %v331_v2  ;;  %1026 = vmatprep.mubr.msk.f32.mxu1 (!%p287_p2), %vm409_vm2, %v407_v9  ;;  %v408_v11 = vld [vmem:[%s1311_s1 + $0x8] sm:$0xff] (!%p287_p2)  ;;  %v495_v13 = vld [vmem:[%s1314_s4] sm:$0xff] (!%p287_p2)  ;;  %vm497_vm3 = vcmask (!%p287_p2), 130048   ;;  %v668_v26 = vld [vmem:[%s1315_s5 + $0x30] sm:$0xff] (!%p287_p2)  ;;  %vm907_vm4 = vcmask (!%p287_p2), 7168  }
   0x8   : > { %1078 = vmatpush3.bf16.msra.mxu0 (!%p287_p2), %v1077_v4  ;;  %v496_v14 = vld [vmem:[%s1314_s4 + $0x8] sm:$0xff] (!%p287_p2)  ;;  %v579_v22 = vld [vmem:[%s1312_s2] sm:$0xff] (!%p287_p2)  ;;  %v669_v27 = vld [vmem:[%s1315_s5 + $0x38] sm:$0xff] (!%p287_p2) }
   0x9   : > { %1079 = vmatprep.subr.bf16.mxu0 (!%p287_p2), %v1129_v3  ;;  %v1082_v15 = vpack.c.bf16 (!%p287_p2), %v496_v14, %v495_v13  ;;  %v666_v23 = vld [vmem:[%s1315_s5 + $0x20] sm:$0xff] (!%p287_p2)  ;;  %v667_v24 = vld [vmem:[%s1315_s5 + $0x28] sm:$0xff] (!%p287_p2)  ;;  %v1094_v28 = vpack.c.bf16 (!%p287_p2), %v669_v27, %v668_v26  ;;  %v664_v36 = vld [vmem:[%s1315_s5 + $0x10] sm:$0xff] (!%p287_p2) }
   0xa   : > { %v1091_v25 = vpack.c.bf16 (!%p287_p2), %v667_v24, %v666_v23  ;;  %v662_v32 = vld [vmem:[%s1315_s5] sm:$0xff] (!%p287_p2)  ;;  %v663_v33 = vld [vmem:[%s1315_s5 + $0x8] sm:$0xff] (!%p287_p2)  ;;  %v665_v37 = vld [vmem:[%s1315_s5 + $0x18] sm:$0xff] (!%p287_p2) }
   0xb   : > { %v580_v34 = vld [vmem:[%s1312_s2 + $0x8] sm:$0xff] (!%p287_p2)  ;;  %v1097_v35 = vpack.c.bf16 (!%p287_p2), %v663_v33, %v662_v32  ;;  %v1100_v38 = vpack.c.bf16 (!%p287_p2), %v665_v37, %v664_v36  ;;  %v816_v39 = vld [vmem:[%s1315_s5 + $0x40] sm:$0xff] (!%p287_p2)  ;;  %v818_v42 = vld [vmem:[%s1315_s5 + $0x50] sm:$0xff] (!%p287_p2) }
   0xc   : > { %1081 = vmatpush3.bf16.msra.mxu0 (!%p287_p2), %v1080_v7  ;;  %v817_v40 = vld [vmem:[%s1315_s5 + $0x48] sm:$0xff] (!%p287_p2)  ;;  %v819_v43 = vld [vmem:[%s1315_s5 + $0x58] sm:$0xff] (!%p287_p2)  ;;  %v979_v53 = vld [vmem:[%s1316_s6] ss:$0 sm:$0xff] (!%p287_p2) }
   0xd   : > { %s1321_s10 = smov (!%p320_p3, %s962_s10), 1  ;;  %1090 = vmatprep.subr.bf16.mxu0 %v1129_v3  ;;  %v1103_v41 = vpack.c.bf16 %v817_v40, %v816_v39  ;;  %v1106_v46 = vpack.c.bf16 %v819_v43, %v818_v42  ;;  %v900_v57 = vld [vmem:[%s1317_s7] sm:$0xff] }
   0xe   : > { %s967_s19 = sshll.u32 %s1321_s10, 3  ;;  %v905_v61 = vld [vmem:[%s1318_s8] sm:$0xff] }
   0xf   : > { %s323_s22 = scalar_lea.vmem %s1310_s0, %s967_s19  ;;  %s327_s12 = scalar_lea.vmem %s1319_s9, %s967_s19 }
  0x10   : > { %v1214_v8 = vld [vmem:[%s323_s22] sm:$0xff] }
  0x11   : > { %1022 = vmatmul.mubr.msk.f32.vlgmr.msra.gmra.mrb[0].mxu0 %vm333_vm1, %v1214_v8 }
  0x12   : > { %1051 = vmatprep.mubr.msk.f32.mxu0 %vm1130_vm0, %v1131_v6  ;;  %1092 = vmatpush3.bf16.msra.mxu0 %v1091_v25 }
  0x13   : > { %1093 = vmatprep.subr.bf16.mxu0 %v1129_v3 }
  0x16   : > { %1095 = vmatpush3.bf16.msra.mxu0 %v1094_v28 }
  0x17   : > { %1102 = vmatprep.subr.bf16.mxu0 %v1129_v3 }
  0xe4   : > { %v403_v10 = vpop.f32.mrb[0].mxu0 }
  0xe5   : > { %v1023_v12 = vpop.f32.mrb[1].mxu0  ;;  %1024 = vmatprep.subr.mxu1 %v403_v10 }
  0xe6   : > { %1025 = vmatpush3.msra.mxu1 %v403_v10 }
  0xe7   : > { %1027 = vmatmul.mubr.msk.f32.vlgmr.msra.gmra.mrb[0].mxu1 %vm409_vm2, %v408_v11  ;;  %1083 = vmatprep.subr.bf16.mxu1 %v1082_v15 }
  0xe8   : > { %1085 = vmatpush3.bf16.msra.mxu1 %v1082_v15 }
 0x1ba   : > { %v1028_v16 = vpop.f32.mrb[0].mxu1 }
 0x1bb   : > { %v492_v17 = vmul.f32 0.2, %v1028_v16  ;;  %v482_v18 = vpop.f32.mrb[1].mxu1 }
 0x1bc   : > { %v491_v19 = vmul.f32 0.2, %v482_v18 }
 0x1bd   : > { %v494_v21 = vmax.f32 %v1028_v16, %v492_v17 }
 0x1be   : > { %v493_v20 = vmax.f32 %v482_v18, %v491_v19 }
 0x1c0   : > { %1033 = vmatprep.mubr.msk.f32.mxu1 %vm497_vm3, %v493_v20 }
 0x1c1   : > { %1034 = vmatmul.mubr.msk.f32.vlgmr.msra.gmra.mrb[2].mxu1 %vm497_vm3, %v494_v21 }
 0x1c2   : > { %1040 = vmatprep.mubr.msk.f32.mxu1 %vm497_vm3, %v579_v22 }
 0x294   : > { %v1035_v29 = vpop.f32.mrb[2].mxu1 }
 0x295   : > { %v570_v30 = vpop.f32.mrb[3].mxu1 }
 0x296   : > { %v1086_v31 = vpack.c.bf16 %v1035_v29, %v570_v30 }
 0x298   : > { %1087 = vmatprep.subr.bf16.mxu1 %v1086_v31 }
 0x299   : > { %1089 = vmatpush3.bf16.msra.mxu1 %v1086_v31 }
 0x29a   : > { %1096 = vmatprep.subr.bf16.mxu1 %v1129_v3 }
 0x29c   : > { %1041 = vmatmul.mubr.msk.f32.vlgmr.msra.gmra.mrb[4].mxu1 %vm497_vm3, %v580_v34 }
 0x29d   : > { %1098 = vmatpush3.bf16.msra.mxu1 %v1097_v35  ;;  %1062 = vmatprep.mubr.msk.f32.mxu1 %vm1130_vm0, %v1131_v6 }
 0x29e   : > { %1099 = vmatprep.subr.bf16.mxu1 %v1129_v3 }
 0x2a1   : > { %1101 = vmatpush3.bf16.msra.mxu1 %v1100_v38 }
 0x36f   : > { %v1042_v44 = vpop.f32.mrb[4].mxu1 }
 0x370   : > { %v653_v45 = vpop.f32.mrb[5].mxu1  ;;  %1052 = vmatmul.mubr.msk.f32.vlgmr.msra.gmra.mrb[2].mxu0 %vm333_vm1, %v1042_v44 }
 0x371   : > { %1104 = vmatpush3.bf16.msra.mxu0 %v1103_v41  ;;  %1063 = vmatmul.mubr.msk.f32.vlgmr.msra.gmra.mrb[6].mxu1 %vm333_vm1, %v653_v45 }
 0x372   : > { %1105 = vmatprep.subr.bf16.mxu0 %v1129_v3  ;;  %1073 = vmatprep.mubr.msk.f32.mxu0 %vm1130_vm0, %v1131_v6 }
 0x375   : > { %1107 = vmatpush3.bf16.msra.mxu0 %v1106_v46 }
 0x378   : > { %1074 = vmatmul.mubr.msk.f32.vlgmr.msra.gmra.mrb[4].mxu0 %vm333_vm1, %v1214_v8 }
 0x443   : > { %v739_v47 = vpop.f32.mrb[2].mxu0 }
 0x444   : > { %v1053_v48 = vpop.f32.mrb[3].mxu0  ;;  %v812_v49 = vpop.f32.mrb[6].mxu1 }
 0x445   : > { %v813_v50 = vadd.f32 %v812_v49, %v739_v47  ;;  %v1064_v51 = vpop.f32.mrb[7].mxu1 }
 0x44b   : > { %v886_v52 = vpop.f32.mrb[4].mxu0 }
 0x44c   : > { %v890_v54 = vadd.f32 %v886_v52, %v813_v50  ;;  %v1075_v55 = vpop.f32.mrb[5].mxu0 }
 0x44e   : > { %v898_v56 = vadd.f32 %v979_v53, %v890_v54 }
 0x450   : > { %1119 = vtanh.f32 %v898_v56 }
 0x45a   : > { %v1120_v58 = vpop.eup %1119 }
 0x45b   : > { %v901_v59 = vmul.f32 %v1120_v58, %v900_v57 }
 0x45d   : > { %v902_v60 = vsel %vm333_vm1, %v901_v59, 0.0 }
 0x45e   : > { %903 = vadd.xlane.f32.xlu0 %v902_v60 }
 0x4eb   : > { %v904_v62 = vpop.xlane.xlu0 %903 }
 0x4ec   : > { %v906_v63 = vadd.f32 %v905_v61, %v904_v62 }
 0x4ee   : > { %908 = vst.msk [vmem:[%s327_s12] sm:$0xff] %vm907_vm4, %v906_v63 }
 0x4ef PF: > { %s19_s30 = sadd.s32 1, %s1127_s30  }
 0x4f0   : > { %p16_p4 = scmp.ge.s32.totalorder %s19_s30, 4  }
 0x4f2   :  { %18 = sbr.rel (!%p16_p4) target bundleno = 1 (0x1), region = 86 }

</bundles_post_ra>
